<compile_context>
chip_gen: v7x
topology: tpu7x:2x2x1
jax: 0.10.0
libtpu: 0.0.40
codegen_flags: <defaults>
</compile_context>

<pallas_src>
import functools

import jax
import jax.numpy as jnp
import numpy as np
from jax.experimental import pallas as pl
from jax.experimental.pallas import tpu as pltpu

# ---------------- Problem configuration (matches nn.Conv2d(in, out, 3, 1, 1)) ----------------
N, C_IN, H, W = 2, 4, 16, 16          # input (NCHW)
C_OUT = 8
KH = KW = 3
STRIDE = 1
PAD = 1                                # "same" conv
BN_EPS = 1e-5
NEG_SLOPE = 0.2


# ------------- Fused kernel: transposed im2col-GEMM + BatchNorm(batch stats) + LeakyReLU -------------
def _fused_convblock_kernel(*refs, cnt, use_bn, use_act):
    # Ref layout (static, chosen by the wrapper):
    #   use_bn=True :  (patches_T, w_T, gamma_beta, out)
    #   use_bn=False:  (patches_T, w_T, bias,       out)
    # patches_T  : (Cin*KH*KW, N*oh*ow)   reduction axis on rows, dense lanes on columns
    # w_T        : (Cout, Cin*KH*KW)
    # gamma_beta : (Cout, 2)              column 0 = gamma, column 1 = beta
    # bias       : (Cout, 1)
    # out        : (Cout, N*oh*ow)        512 dense lanes per row -> unmasked stores, no relayout
    if use_bn:
        p_ref, w_ref, gb_ref, o_ref = refs
    else:
        p_ref, w_ref, bias_ref, o_ref = refs

    # Single GEMM on the MXU, f32 accumulation: (Cout, K) x (K, R) -> (Cout, R).
    y = jnp.dot(w_ref[...], p_ref[...], preferred_element_type=jnp.float32)

    if use_bn:
        # Conv bias omitted entirely: cancelled by the mean subtraction below.
        inv_cnt = 1.0 / float(cnt)
        mean = jnp.sum(y, axis=-1, keepdims=True) * inv_cnt        # (Cout, 1)  lane-reduce (XLU)
        d = y - mean
        var = jnp.sum(d * d, axis=-1, keepdims=True) * inv_cnt     # two-pass, biased var (PyTorch fwd)
        gb = gb_ref[...]                                           # (Cout, 2)
        scale = gb[:, 0:1] * jax.lax.rsqrt(var + BN_EPS)           # gamma / sqrt(var + eps)
        y = d * scale + gb[:, 1:2]                                 # reuse centered values
    else:
        y = y + bias_ref[...]                                      # (Cout, 1) broadcast over lanes

    if use_act:
        y = jnp.where(y >= 0, y, NEG_SLOPE * y)                    # LeakyReLU(0.2)

    o_ref[...] = y


# ---------------- ConvBlock forward (one jit: layout plumbing + one pallas_call) ----------------
@functools.partial(jax.jit, static_argnames=("use_activation", "use_batchnorm"))
def conv_block_forward(x_nchw, w_oihw, bias, gamma, beta,
                       use_activation=True, use_batchnorm=True):
    n, cin, h, w = x_nchw.shape
    cout = w_oihw.shape[0]
    out_h = (h + 2 * PAD - KH) // STRIDE + 1
    out_w = (w + 2 * PAD - KW) // STRIDE + 1
    r_cols = n * out_h * out_w                       # 512 output lanes
    k_rows = cin * KH * KW                           # 36-deep reduction

    # Spatial zero-pad directly on NCHW (no NCHW->NHWC transpose needed any more).
    x_pad = jnp.pad(x_nchw.astype(jnp.float32),
                    ((0, 0), (0, 0), (PAD, PAD), (PAD, PAD)))

    # Transposed im2col: rows ordered (cin, kh, kw) to match w.reshape(Cout, Cin*KH*KW),
    # columns ordered (n, oh, ow) to match the NCHW-major output.
    taps = [x_pad[:, :, r:r + out_h, c:c + out_w]    # each (N, Cin, oh, ow)
            for r in range(KH) for c in range(KW)]
    pt = jnp.stack(taps, axis=0)                     # (KH*KW, N, Cin, oh, ow)
    patches_t = jnp.transpose(pt, (2, 0, 1, 3, 4)).reshape(k_rows, r_cols)

    w_t = w_oihw.reshape(cout, k_rows).astype(jnp.float32)   # (Cout, Cin*KH*KW) -- pure reshape

    if use_batchnorm:
        gb = jnp.stack([gamma.astype(jnp.float32),
                        beta.astype(jnp.float32)], axis=1)   # (Cout, 2): gamma | beta packed
        operands = (patches_t, w_t, gb)
    else:
        operands = (patches_t, w_t, bias.astype(jnp.float32).reshape(cout, 1))

    kern = functools.partial(
        _fused_convblock_kernel,
        cnt=r_cols, use_bn=use_batchnorm, use_act=use_activation,
    )

    cost = pl.CostEstimate(
        flops=2 * cout * k_rows * r_cols + 8 * cout * r_cols,
        transcendentals=cout,
        bytes_accessed=4 * (k_rows * r_cols + cout * k_rows + 2 * cout + cout * r_cols),
    )

    out2d = pl.pallas_call(
        kern,
        out_shape=jax.ShapeDtypeStruct((cout, r_cols), jnp.float32),
        grid_spec=pltpu.PrefetchScalarGridSpec(
            num_scalar_prefetch=0,
            grid=(1,),                                # single block: BN stats over the whole batch
            in_specs=[pl.BlockSpec(op.shape, lambda i: (0, 0)) for op in operands],
            out_specs=pl.BlockSpec((cout, r_cols), lambda i: (0, 0)),
        ),
        compiler_params=pltpu.CompilerParams(dimension_semantics=("arbitrary",)),
        cost_estimate=cost,
    )(*operands)

    # (Cout, N*oh*ow) is already NCHW-major: reshape + leading-axis swap only.
    return jnp.transpose(out2d.reshape(cout, n, out_h, out_w), (1, 0, 2, 3))


# ---------------- Pure-JAX reference for validation ----------------
def conv_block_reference(x_nchw, w_oihw, bias, gamma, beta,
                         use_activation=True, use_batchnorm=True):
    cout = w_oihw.shape[0]
    x_nhwc = jnp.transpose(x_nchw, (0, 2, 3, 1)).astype(jnp.float32)
    w_hwio = jnp.transpose(w_oihw, (2, 3, 1, 0))
    y = jax.lax.conv_general_dilated(
        x_nhwc, w_hwio, window_strides=(STRIDE, STRIDE),
        padding=((PAD, PAD), (PAD, PAD)),
        dimension_numbers=("NHWC", "HWIO", "NHWC"),
        preferred_element_type=jnp.float32,
    ) + bias.reshape(1, 1, 1, cout)
    if use_batchnorm:
        mean = jnp.mean(y, axis=(0, 1, 2), keepdims=True)
        var = jnp.mean((y - mean) ** 2, axis=(0, 1, 2), keepdims=True)
        y = (y - mean) * jax.lax.rsqrt(var + BN_EPS)
        y = y * gamma.reshape(1, 1, 1, cout) + beta.reshape(1, 1, 1, cout)
    if use_activation:
        y = jnp.where(y >= 0, y, NEG_SLOPE * y)
    return jnp.transpose(y, (0, 3, 1, 2))


if __name__ == "__main__":
    key = jax.random.PRNGKey(0)
    kx, kw, kb, kg, kbeta = jax.random.split(key, 5)

    # Deterministic synthetic parameters (shapes follow nn.Conv2d / nn.BatchNorm2d __init__)
    x = jax.random.normal(kx, (N, C_IN, H, W), dtype=jnp.float32)
    fan_in = C_IN * KH * KW
    w = jax.random.normal(kw, (C_OUT, C_IN, KH, KW), dtype=jnp.float32) / np.sqrt(fan_in)
    b = jax.random.normal(kb, (C_OUT,), dtype=jnp.float32) * 0.1
    gamma = 1.0 + 0.1 * jax.random.normal(kg, (C_OUT,), dtype=jnp.float32)
    beta = 0.1 * jax.random.normal(kbeta, (C_OUT,), dtype=jnp.float32)

    # Default ConvBlock config: Conv + BatchNorm(train stats) + LeakyReLU(0.2).
    out = jax.block_until_ready(conv_block_forward(
        x, w, b, gamma, beta, use_activation=True, use_batchnorm=True))
    ref = jax.block_until_ready(conv_block_reference(
        x, w, b, gamma, beta, use_activation=True, use_batchnorm=True))
    np.testing.assert_allclose(np.asarray(out), np.asarray(ref), rtol=2e-3, atol=2e-3)

    # use_BatchNorm=False path (conv bias + LeakyReLU), previously untested.
    out_nb = jax.block_until_ready(conv_block_forward(
        x, w, b, gamma, beta, use_activation=True, use_batchnorm=False))
    ref_nb = jax.block_until_ready(conv_block_reference(
        x, w, b, gamma, beta, use_activation=True, use_batchnorm=False))
    np.testing.assert_allclose(np.asarray(out_nb), np.asarray(ref_nb), rtol=2e-3, atol=2e-3)

    # use_activation=False path (raw conv+BN output).
    out_na = jax.block_until_ready(conv_block_forward(
        x, w, b, gamma, beta, use_activation=False, use_batchnorm=True))
    ref_na = jax.block_until_ready(conv_block_reference(
        x, w, b, gamma, beta, use_activation=False, use_batchnorm=True))
    np.testing.assert_allclose(np.asarray(out_na), np.asarray(ref_na), rtol=2e-3, atol=2e-3)

    # TODO(synk): BatchNorm running_mean/running_var buffer updates are not modeled (they do
    # not affect the training-mode forward output).

    print("KERNEL_OK")
</pallas_src>

<mosaic_0001>
module attributes {stable_mosaic.version = 11 : i64} {
  func.func @_fused_convblock_kernel(%arg0: i32, %arg1: memref<36x512xf32, #tpu.memory_space<vmem>>, %arg2: memref<8x36xf32, #tpu.memory_space<vmem>>, %arg3: memref<8x2xf32, #tpu.memory_space<vmem>>, %arg4: memref<8x512xf32, #tpu.memory_space<vmem>>) attributes {dimension_semantics = [#tpu.dimension_semantics<arbitrary>], iteration_bounds = array<i64: 1>, scalar_prefetch = 0 : i64, scratch_operands = 0 : i64, tpu.core_type = #tpu.core_type<tc>, window_params = [{pipeline_mode = #tpu.pipeline_mode<synchronous>, transform_indices = @transform_0, window_bounds = array<i64: 36, 512>}, {pipeline_mode = #tpu.pipeline_mode<synchronous>, transform_indices = @transform_1, window_bounds = array<i64: 8, 36>}, {pipeline_mode = #tpu.pipeline_mode<synchronous>, transform_indices = @transform_2, window_bounds = array<i64: 8, 2>}, {pipeline_mode = #tpu.pipeline_mode<synchronous>, transform_indices = @transform_3, window_bounds = array<i64: 8, 512>}]} {
    %c0 = arith.constant 0 : index
    %c0_0 = arith.constant 0 : index
    %0 = vector.load %arg2[%c0, %c0_0] : memref<8x36xf32, #tpu.memory_space<vmem>>, vector<8x36xf32>
    %c0_1 = arith.constant 0 : index
    %c0_2 = arith.constant 0 : index
    %1 = vector.load %arg1[%c0_1, %c0_2] : memref<36x512xf32, #tpu.memory_space<vmem>>, vector<36x512xf32>
    %cst = arith.constant dense<0.000000e+00> : vector<8x512xf32>
    %2 = tpu.matmul %0, %1, %cst {dimension_numbers = #tpu.dot_dimension_numbers<[1], [0], [0], [1], [0, 0, 1, 1], [], []>} : vector<8x36xf32>, vector<36x512xf32>, vector<8x512xf32> -> vector<8x512xf32>
    %cst_3 = arith.constant dense<0.000000e+00> : vector<8xf32>
    %3 = vector.multi_reduction <add>, %2, %cst_3 [1] : vector<8x512xf32> to vector<8xf32>
    %4 = vector.shape_cast %3 : vector<8xf32> to vector<8x1xf32>
    %cst_4 = arith.constant 0.001953125 : f32
    %5 = vector.broadcast %cst_4 : f32 to vector<8x1xf32>
    %6 = arith.mulf %4, %5 : vector<8x1xf32>
    %7 = vector.broadcast %6 : vector<8x1xf32> to vector<8x512xf32>
    %8 = arith.subf %2, %7 : vector<8x512xf32>
    %9 = arith.mulf %8, %8 : vector<8x512xf32>
    %cst_5 = arith.constant dense<0.000000e+00> : vector<8xf32>
    %10 = vector.multi_reduction <add>, %9, %cst_5 [1] : vector<8x512xf32> to vector<8xf32>
    %11 = vector.shape_cast %10 : vector<8xf32> to vector<8x1xf32>
    %cst_6 = arith.constant 0.001953125 : f32
    %12 = vector.broadcast %cst_6 : f32 to vector<8x1xf32>
    %13 = arith.mulf %11, %12 : vector<8x1xf32>
    %c0_7 = arith.constant 0 : index
    %c0_8 = arith.constant 0 : index
    %14 = vector.load %arg3[%c0_7, %c0_8] : memref<8x2xf32, #tpu.memory_space<vmem>>, vector<8x2xf32>
    %15 = vector.extract_strided_slice %14 {offsets = [0, 0], sizes = [8, 1], strides = [1, 1]} : vector<8x2xf32> to vector<8x1xf32>
    %cst_9 = arith.constant 9.99999974E-6 : f32
    %16 = vector.broadcast %cst_9 : f32 to vector<8x1xf32>
    %17 = arith.addf %13, %16 : vector<8x1xf32>
    %18 = math.rsqrt %17 : vector<8x1xf32>
    %19 = arith.mulf %15, %18 : vector<8x1xf32>
    %20 = vector.broadcast %19 : vector<8x1xf32> to vector<8x512xf32>
    %21 = arith.mulf %8, %20 : vector<8x512xf32>
    %22 = vector.extract_strided_slice %14 {offsets = [0, 1], sizes = [8, 1], strides = [1, 1]} : vector<8x2xf32> to vector<8x1xf32>
    %23 = vector.broadcast %22 : vector<8x1xf32> to vector<8x512xf32>
    %24 = arith.addf %21, %23 : vector<8x512xf32>
    %cst_10 = arith.constant 0.000000e+00 : f32
    %25 = vector.broadcast %cst_10 : f32 to vector<8x512xf32>
    %26 = arith.cmpf oge, %24, %25 : vector<8x512xf32>
    %cst_11 = arith.constant 2.000000e-01 : f32
    %27 = vector.broadcast %cst_11 : f32 to vector<8x512xf32>
    %28 = arith.mulf %27, %24 : vector<8x512xf32>
    %29 = arith.select %26, %24, %28 : vector<8x512xi1>, vector<8x512xf32>
    %c0_12 = arith.constant 0 : index
    %c0_13 = arith.constant 0 : index
    %30 = vector.load %arg4[%c0_12, %c0_13] : memref<8x512xf32, #tpu.memory_space<vmem>>, vector<8x512xf32>
    tpu.vector_store %arg4[%c0_12, %c0_13], %29 {strides = array<i32>} : memref<8x512xf32, #tpu.memory_space<vmem>>, vector<8x512xf32>,
    return
  }
  func.func @transform_0(%arg0: i32) -> (i32, i32) {
    %c0_i32 = arith.constant 0 : i32
    %c0_i32_0 = arith.constant 0 : i32
    %c0_i32_1 = arith.constant 0 : i32
    return %c0_i32, %c0_i32_0 : i32, i32
  }
  func.func @transform_1(%arg0: i32) -> (i32, i32) {
    %c0_i32 = arith.constant 0 : i32
    %c0_i32_0 = arith.constant 0 : i32
    %c0_i32_1 = arith.constant 0 : i32
    return %c0_i32, %c0_i32_0 : i32, i32
  }
  func.func @transform_2(%arg0: i32) -> (i32, i32) {
    %c0_i32 = arith.constant 0 : i32
    %c0_i32_0 = arith.constant 0 : i32
    %c0_i32_1 = arith.constant 0 : i32
    return %c0_i32, %c0_i32_0 : i32, i32
  }
  func.func @transform_3(%arg0: i32) -> (i32, i32) {
    %c0_i32 = arith.constant 0 : i32
    %c0_i32_0 = arith.constant 0 : i32
    %c0_i32_1 = arith.constant 0 : i32
    return %c0_i32, %c0_i32_0 : i32, i32
  }
}

</mosaic_0001>

<bundles_post_ra>
// kernel: conv_block_forward.1
= control target key start
LH: loop header
LB: loop body
LE: loop exit
PB: predicated region body
PF: predicated region fallthrough
CT: control target
= control target key end

     0   :  { %v286_v3 = vmov 0.0   ;;  %vm39_vm0 = vcmask 1043456   ;;  %vm35_vm1 = vcmask 293888   ;;  %v287_v50 = vmov 0   ;;  %s387_s0 = inlined_call_operand.vmem [shape: f32[36,512], index: 0, kind: input, shape index: {}]   ;;  %s388_s1 = inlined_call_operand.vmem [shape: f32[8,36], index: 1, kind: input, shape index: {}]   ;;  %s389_s2 = inlined_call_operand.vmem [shape: f32[8,2], index: 2, kind: input, shape index: {}]   ;;  %s390_s3 = inlined_call_operand.vmem [shape: f32[8,512], index: 3, kind: output, shape index: {}]  }
   0x1   :  { %v16_v0 = vld [vmem:[%s387_s0 + $0x8] sm:$0xff]  ;;  %v15_v2 = vld [vmem:[%s387_s0] sm:$0xff]  ;;  %116 = vmatprep.mubr.f32.mxu0 %v286_v3  ;;  %187 = vmatprep.mubr.f32.mxu1 %v286_v3  ;;  %v18_v6 = vld [vmem:[%s387_s0 + $0x18] sm:$0xff]  ;;  %v288_v51 = vmov 1  }
   0x2   :  { %v20_v1 = vld [vmem:[%s387_s0 + $0x28] sm:$0xff]  ;;  %v19_v5 = vld [vmem:[%s387_s0 + $0x20] sm:$0xff]  ;;  %v22_v7 = vld [vmem:[%s387_s0 + $0x38] sm:$0xff]  ;;  %281 = vset.pattern.permute.xlu1 %v287_v50  ;;  %283 = vset.pattern.permute.xlu0 %v288_v51 }
   0x3   :  { %v262_v4 = vpack.c.bf16 %v20_v1, %v16_v0  ;;  %v264_v8 = vpack.c.bf16 %v19_v5, %v15_v2  ;;  %v270_v9 = vpack.c.bf16 %v22_v7, %v18_v6  ;;  %v17_v10 = vld [vmem:[%s387_s0 + $0x10] sm:$0xff]  ;;  %v24_v12 = vld [vmem:[%s387_s0 + $0x48] sm:$0xff]  ;;  %v23_v15 = vld [vmem:[%s387_s0 + $0x40] sm:$0xff] }
   0x4   :  { %v21_v11 = vld [vmem:[%s387_s0 + $0x30] sm:$0xff]  ;;  %v28_v14 = vld [vmem:[%s387_s0 + $0x68] sm:$0xff]  ;;  %v27_v16 = vld [vmem:[%s387_s0 + $0x60] sm:$0xff] }
   0x5   :  { %263 = vmatprep.subr.bf16.mxu0 %v262_v4  ;;  %v272_v13 = vpack.c.bf16 %v21_v11, %v17_v10  ;;  %271 = vmatprep.subr.bf16.mxu1 %v270_v9  ;;  %v266_v17 = vpack.c.bf16 %v28_v14, %v24_v12  ;;  %v268_v18 = vpack.c.bf16 %v27_v16, %v23_v15  ;;  %v26_v19 = vld [vmem:[%s387_s0 + $0x58] sm:$0xff]  ;;  %v25_v21 = vld [vmem:[%s387_s0 + $0x50] sm:$0xff]  ;;  %v32_v25 = vld [vmem:[%s387_s0 + $0x88] sm:$0xf] }
   0x6   :  { %265 = vmatpush1.bf16.msra.mxu0 %v264_v8  ;;  %v30_v20 = vld [vmem:[%s387_s0 + $0x78] sm:$0xff]  ;;  %v29_v23 = vld [vmem:[%s387_s0 + $0x70] sm:$0xff]  ;;  %v31_v27 = vld [vmem:[%s387_s0 + $0x80] sm:$0xf] }
   0x7   :  { %273 = vmatpush1.bf16.msra.mxu1 %v272_v13  ;;  %v274_v22 = vpack.c.bf16 %v30_v20, %v26_v19  ;;  %267 = vmatprep.subr.bf16.mxu0 %v266_v17  ;;  %v276_v24 = vpack.c.bf16 %v29_v23, %v25_v21  ;;  %v34_v26 = vld [vmem:[%s387_s0 + $0x98] sm:$0xf]  ;;  %v14_v28 = vld [vmem:[%s388_s1] sm:$0xff]  ;;  %v33_v29 = vld [vmem:[%s387_s0 + $0x90] sm:$0xf] }
   0x8   :  { %v214_v55 = vld [vmem:[%s389_s2] sm:$0xff] }
   0x9   :  { %275 = vmatprep.subr.bf16.mxu1 %v274_v22 }
   0xa   :  { %269 = vmatpush1.bf16.msra.mxu0 %v268_v18 }
   0xb   :  { %277 = vmatpush1.bf16.msra.mxu1 %v276_v24  ;;  %256 = vmatprep.subr.msk.mxu0 %vm39_vm0, %v32_v25 }
   0xc   :  { %259 = vmatprep.subr.msk.mxu1 %vm39_vm0, %v34_v26 }
   0xe   :  { %257 = vmatpush1.msk.msra.mxu0 %vm39_vm0, %v31_v27 }
   0xf   :  { %258 = vmatmul.mubr.msk.f32.vlgmr.msra.gmra.mrb[0].mxu0 %vm35_vm1, %v14_v28  ;;  %260 = vmatpush1.msk.msra.mxu1 %vm39_vm0, %v33_v29 }
  0x10   :  { %261 = vmatmul.mubr.msk.f32.vlgmr.msra.gmra.mrb[0].mxu1 %vm35_vm1, %v14_v28 }
  0xe2   :  { %v118_v30 = vpop.f32.mrb[0].mxu0 }
  0xe3   :  { %v120_v31 = vpop.f32.mrb[1].mxu0  ;;  %v189_v32 = vpop.f32.mrb[0].mxu1 }
  0xe4   :  { %v194_v33 = vadd.f32 %v120_v31, %v118_v30  ;;  %v191_v34 = vpop.f32.mrb[1].mxu1 }
  0xe6   :  { %v195_v35 = vadd.f32 %v194_v33, %v189_v32 }
  0xe8   :  { %v196_v36 = vadd.f32 %v195_v35, %v191_v34 }
  0xea   :  { %197 = vadd.xlane.f32.xlu0 %v196_v36 }
 0x177   :  { %v198_v37 = vpop.xlane.xlu0 %197 }
 0x178   :  { %v199_v38 = vmul.f32 0.001953125, %v198_v37 }
 0x17a   :  { %v200_v39 = vsub.f32 %v118_v30, %v199_v38  ;;  %v201_v40 = vsub.f32 %v120_v31, %v199_v38  ;;  %v202_v41 = vsub.f32 %v189_v32, %v199_v38  ;;  %v203_v42 = vsub.f32 %v191_v34, %v199_v38 }
 0x17c   :  { %v204_v43 = vmul.f32 %v200_v39, %v200_v39  ;;  %v205_v44 = vmul.f32 %v201_v40, %v201_v40  ;;  %v206_v45 = vmul.f32 %v202_v41, %v202_v41  ;;  %v207_v47 = vmul.f32 %v203_v42, %v203_v42 }
 0x17e   :  { %v208_v46 = vadd.f32 %v205_v44, %v204_v43 }
 0x180   :  { %v209_v48 = vadd.f32 %v208_v46, %v206_v45 }
 0x182   :  { %v210_v49 = vadd.f32 %v209_v48, %v207_v47 }
 0x184   :  { %211 = vadd.xlane.f32.xlu0 %v210_v49 }
 0x211   :  { %v212_v52 = vpop.xlane.xlu0 %211 }
 0x212   :  { %v213_v53 = vmul.f32 0.001953125, %v212_v52 }
 0x214   :  { %v215_v54 = vadd.f32 1e-05, %v213_v53 }
 0x216   :  { %284 = vrsqrt.f32 %v215_v54 }
 0x220   :  { %v285_v56 = vpop.eup %284 }
 0x221   :  { %v217_v57 = vmul.f32 %v285_v56, %v214_v55 }
 0x223   :  { %220 = vperm.xlu1 %281, %v217_v57  }
 0x227   :  { %282 = vset.pattern.permute.xlu1 %v288_v51 }
 0x228   :  { %229 = vperm.xlu1 %282, %v214_v55  }
 0x2a2   :  { %v221_v58 = vpop.permute.xlu1 %220 }
 0x2a3   :  { %v223_v59 = vmul.f32 %v221_v58, %v200_v39  ;;  %v224_v60 = vmul.f32 %v221_v58, %v201_v40  ;;  %v225_v61 = vmul.f32 %v221_v58, %v202_v41  ;;  %v226_v62 = vmul.f32 %v221_v58, %v203_v42 }
 0x2a7   :  { %v230_v63 = vpop.permute.xlu1 %229 }
 0x2a8   :  { %v232_v0 = vadd.f32 %v230_v63, %v223_v59  ;;  %v233_v1 = vadd.f32 %v230_v63, %v224_v60  ;;  %v234_v2 = vadd.f32 %v230_v63, %v225_v61  ;;  %v235_v3 = vadd.f32 %v230_v63, %v226_v62 }
 0x2aa   :  { %vm236_vm2 = vcmp.ge.f32.partialorder %v232_v0, 0.0  ;;  %vm237_vm3 = vcmp.ge.f32.partialorder %v233_v1, 0.0  ;;  %vm238_vm4 = vcmp.ge.f32.partialorder %v234_v2, 0.0  ;;  %vm239_vm5 = vcmp.ge.f32.partialorder %v235_v3, 0.0 }
 0x2ab   :  { %v240_v4 = vmul.f32 0.2, %v232_v0  ;;  %v241_v5 = vmul.f32 0.2, %v233_v1  ;;  %v242_v6 = vmul.f32 0.2, %v234_v2 }
 0x2ac   :  { %v243_v7 = vmul.f32 0.2, %v235_v3 }
 0x2ad   :  { %v244_v8 = vsel %vm236_vm2, %v232_v0, %v240_v4  ;;  %v245_v9 = vsel %vm237_vm3, %v233_v1, %v241_v5  ;;  %v246_v10 = vsel %vm238_vm4, %v234_v2, %v242_v6 }
 0x2ae   :  { %v247_v11 = vsel %vm239_vm5, %v235_v3, %v243_v7  ;;  %248 = vst [vmem:[%s390_s3] sm:$0xff] %v244_v8  ;;  %249 = vst [vmem:[%s390_s3 + $0x8] sm:$0xff] %v245_v9 }
 0x2af   :  { %250 = vst [vmem:[%s390_s3 + $0x10] sm:$0xff] %v246_v10  ;;  %251 = vst [vmem:[%s390_s3 + $0x18] sm:$0xff] %v247_v11 }

</bundles_post_ra>
